<compile_context>
chip_gen: v7x
topology: tpu7x:2x2x1
jax: 0.10.0
libtpu: 0.0.40
codegen_flags: <defaults>
</compile_context>

<pallas_src>
import functools

import numpy as np

import jax
import jax.numpy as jnp
from jax import lax
from jax.experimental import pallas as pl
from jax.experimental.pallas import tpu as pltpu

_LANES = 128
_I32_MIN = jnp.iinfo(jnp.int32).min
_I32_MAX = jnp.iinfo(jnp.int32).max


def _float_to_ordered_int(bits_i32):
    # Monotone map: float32 bit pattern (viewed as int32) -> sortable int32.
    sign_fill = jnp.right_shift(bits_i32, 31)                 # 0 or -1 (arith shift)
    return bits_i32 ^ (sign_fill & jnp.int32(0x7FFFFFFF))


def _ordered_int_to_float(key_i32):
    # The map above is an involution, so the inverse is the same xor trick.
    sign_fill = jnp.right_shift(key_i32, 31)
    return pltpu.bitcast(key_i32 ^ (sign_fill & jnp.int32(0x7FFFFFFF)), jnp.float32)


def _ema_quantile_kernel(params_ref, x_ref, y_ref, stats_ref, *, k_lo, k_hi):
    # params_ref (SMEM, (4,) f32): [decay, ema_lower, ema_upper, min_scale]
    decay = params_ref[0]
    ema_lower = params_ref[1]
    ema_upper = params_ref[2]
    min_scale = params_ref[3]

    # Stash the order-preserving int32 keys in the output buffer (reinterpreted
    # as f32 bits).  Avoids a separate full-size VMEM temporary; y_ref is
    # overwritten with the normalized result at the end.
    keys0 = _float_to_ordered_int(pltpu.bitcast(x_ref[...], jnp.int32))
    y_ref[...] = pltpu.bitcast(keys0, jnp.float32)

    imin = jnp.full((1, 1), _I32_MIN, jnp.int32)
    imax = jnp.full((1, 1), _I32_MAX, jnp.int32)

    def step(carry):
        lo_l, hi_l, lo_u, hi_u = carry
        # overflow-safe floor((lo + hi) / 2)
        mid_l = jnp.right_shift(lo_l, 1) + jnp.right_shift(hi_l, 1) + (lo_l & hi_l & 1)
        mid_u = jnp.right_shift(lo_u, 1) + jnp.right_shift(hi_u, 1) + (lo_u & hi_u & 1)
        keys = pltpu.bitcast(y_ref[...], jnp.int32)            # one load, two counts
        cnt_l = jnp.sum((keys <= mid_l).astype(jnp.int32), keepdims=True)  # (1, 1)
        cnt_u = jnp.sum((keys <= mid_u).astype(jnp.int32), keepdims=True)  # (1, 1)
        p_l = cnt_l >= (k_lo + 1)
        p_u = cnt_u >= (k_hi + 1)
        return (jnp.where(p_l, lo_l, mid_l + 1), jnp.where(p_l, mid_l, hi_l),
                jnp.where(p_u, lo_u, mid_u + 1), jnp.where(p_u, mid_u, hi_u))

    def body(_, carry):                                        # manual unroll x2
        return step(step(carry))

    lo_l, _, lo_u, _ = lax.fori_loop(0, 16, body, (imin, imax, imin, imax))

    lower = _ordered_int_to_float(lo_l)                        # (1, 1) f32
    upper = _ordered_int_to_float(lo_u)                        # (1, 1) f32

    new_lower = decay * ema_lower + (1.0 - decay) * lower
    new_upper = decay * ema_upper + (1.0 - decay) * upper
    scale = jnp.maximum(new_upper - new_lower, min_scale)      # (1, 1)
    inv_scale = 1.0 / scale                                    # single exact scalar rcp

    y_ref[...] = x_ref[...] * inv_scale                        # pure vld/vmul/vst pass

    lane = lax.broadcasted_iota(jnp.int32, (1, _LANES), 1)
    stats_ref[...] = jnp.where(lane == 0, new_lower,
                               jnp.where(lane == 1, new_upper, 0.0))


@functools.partial(jax.jit, static_argnames=("k_lo", "k_hi"))
def ema_quantile_normalize(x, decay, ema_lower, ema_upper, min_scale, *, k_lo, k_hi):
    assert x.dtype == jnp.float32
    orig_shape = x.shape
    n = x.size
    flat = x.reshape(-1)
    pad = (-n) % _LANES
    if pad:
        # Rare fallback (one copy); +inf padding never perturbs the quantiles
        # since k_hi < n.  Main path (n % 128 == 0) is copy-free.
        flat = jnp.pad(flat, (0, pad), constant_values=jnp.inf)
    rows = flat.size // _LANES
    x2d = flat.reshape(rows, _LANES)

    params = jnp.stack([jnp.asarray(decay, jnp.float32),
                        jnp.asarray(ema_lower, jnp.float32),
                        jnp.asarray(ema_upper, jnp.float32),
                        jnp.asarray(min_scale, jnp.float32)])

    # x block + y block (double-buffered by the runtime) + slack.
    vmem_limit = int(min(max(6 * rows * _LANES * 4 + (2 << 20), 16 << 20), 64 << 20))

    kernel = functools.partial(_ema_quantile_kernel, k_lo=int(k_lo), k_hi=int(k_hi))
    y2d, stats = pl.pallas_call(
        kernel,
        grid=(1,),
        out_shape=(jax.ShapeDtypeStruct((rows, _LANES), jnp.float32),
                   jax.ShapeDtypeStruct((1, _LANES), jnp.float32)),
        in_specs=[pl.BlockSpec(memory_space=pltpu.MemorySpace.SMEM),
                  pl.BlockSpec((rows, _LANES), lambda i: (0, 0))],
        out_specs=(pl.BlockSpec((rows, _LANES), lambda i: (0, 0)),
                   pl.BlockSpec((1, _LANES), lambda i: (0, 0))),
        compiler_params=pltpu.CompilerParams(
            dimension_semantics=("arbitrary",),
            vmem_limit_bytes=vmem_limit),
    )(params, x2d)

    if pad:
        y = y2d.reshape(-1)[:n].reshape(orig_shape)
    else:
        y = y2d.reshape(orig_shape)
    return y, stats[0, 0], stats[0, 1]


class EMAQuantileNormalizer:
    """JAX/Pallas port of ssm_rl.util.normalizer.EMAQuantileNormalizer."""

    def __init__(self, decay, lower_quantile=0.05, upper_quantile=0.95,
                 min_scale=1.0):
        self._decay = float(decay)
        self._lower_quantile = float(lower_quantile)
        self._upper_quantile = float(upper_quantile)
        # buffers: torch registers _ema_lower=0, _ema_upper=1, _min_scale
        # (kept device-resident so no per-step host sync is required).
        self._ema_lower = jnp.asarray(0.0, jnp.float32)
        self._ema_upper = jnp.asarray(1.0, jnp.float32)
        self._min_scale = jnp.asarray(min_scale, jnp.float32)
        self._ct = 0

    def __call__(self, x):
        n = x.size
        k_lo = int(self._lower_quantile * n)
        k_hi = int(self._upper_quantile * n)
        decay = min(self._ct / (self._ct + 1), self._decay)
        y, new_lower, new_upper = ema_quantile_normalize(
            x, jnp.asarray(decay, jnp.float32), self._ema_lower, self._ema_upper,
            self._min_scale, k_lo=k_lo, k_hi=k_hi)
        self._ema_lower = new_lower        # device scalars; no host round-trip
        self._ema_upper = new_upper
        self._ct += 1
        return y


class _NumpyRef:
    """Pure-numpy replica of the PyTorch forward for verification."""

    def __init__(self, decay, lower_quantile=0.05, upper_quantile=0.95,
                 min_scale=1.0):
        self.decay = decay
        self.lq = lower_quantile
        self.uq = upper_quantile
        self.ema_l = 0.0
        self.ema_u = 1.0
        self.min_scale = min_scale
        self.ct = 0

    def __call__(self, x):
        flat = np.sort(np.asarray(x).reshape(-1))
        lower = flat[int(self.lq * flat.size)]
        upper = flat[int(self.uq * flat.size)]
        d = min(self.ct / (self.ct + 1), self.decay)
        self.ema_l = d * self.ema_l + (1.0 - d) * lower
        self.ema_u = d * self.ema_u + (1.0 - d) * upper
        self.ct += 1
        return x / max(self.ema_u - self.ema_l, self.min_scale)


if __name__ == "__main__":
    key = jax.random.PRNGKey(0)
    # layout: NCHW, matching the PyTorch convention (B=2, C=4, H=W=16).
    x = jax.random.normal(key, (2, 4, 16, 16), dtype=jnp.float32)

    norm = EMAQuantileNormalizer(decay=0.99)
    y1 = norm(x)                  # ct=0 -> decay=0 path
    jax.block_until_ready(y1)
    y2 = norm(x * 2.0)            # ct=1 -> decay=0.5 path (exercises EMA)
    jax.block_until_ready(y2)

    ref = _NumpyRef(decay=0.99)
    r1 = ref(np.asarray(x))
    r2 = ref(np.asarray(x) * 2.0)

    np.testing.assert_allclose(np.asarray(y1), r1, rtol=1e-5, atol=1e-5)
    np.testing.assert_allclose(np.asarray(y2), r2, rtol=1e-5, atol=1e-5)

    print("KERNEL_OK")
</pallas_src>

<mosaic_0001>
module attributes {stable_mosaic.version = 11 : i64} {
  func.func @_ema_quantile_kernel(%arg0: i32, %arg1: memref<4xf32, #tpu.memory_space<smem>>, %arg2: memref<16x128xf32, #tpu.memory_space<vmem>>, %arg3: memref<16x128xf32, #tpu.memory_space<vmem>>, %arg4: memref<1x128xf32, #tpu.memory_space<vmem>>) attributes {dimension_semantics = [#tpu.dimension_semantics<arbitrary>], iteration_bounds = array<i64: 1>, scalar_prefetch = 0 : i64, scratch_operands = 0 : i64, tpu.core_type = #tpu.core_type<tc>, window_params = [{transform_indices = @transform_0, window_bounds = array<i64: 4>}, {pipeline_mode = #tpu.pipeline_mode<synchronous>, transform_indices = @transform_1, window_bounds = array<i64: 16, 128>}, {pipeline_mode = #tpu.pipeline_mode<synchronous>, transform_indices = @transform_2, window_bounds = array<i64: 16, 128>}, {pipeline_mode = #tpu.pipeline_mode<synchronous>, transform_indices = @transform_3, window_bounds = array<i64: 1, 128>}]} {
    %c0 = arith.constant 0 : index
    %0 = memref.load %arg1[%c0] : memref<4xf32, #tpu.memory_space<smem>>
    %c1 = arith.constant 1 : index
    %1 = memref.load %arg1[%c1] : memref<4xf32, #tpu.memory_space<smem>>
    %c2 = arith.constant 2 : index
    %2 = memref.load %arg1[%c2] : memref<4xf32, #tpu.memory_space<smem>>
    %c3 = arith.constant 3 : index
    %3 = memref.load %arg1[%c3] : memref<4xf32, #tpu.memory_space<smem>>
    %c0_0 = arith.constant 0 : index
    %c0_1 = arith.constant 0 : index
    %4 = vector.load %arg2[%c0_0, %c0_1] : memref<16x128xf32, #tpu.memory_space<vmem>>, vector<16x128xf32>
    %5 = tpu.bitcast %4 : vector<16x128xf32> -> vector<16x128xi32>
    %c31_i32 = arith.constant 31 : i32
    %6 = vector.broadcast %c31_i32 : i32 to vector<16x128xi32>
    %7 = arith.shrsi %5, %6 : vector<16x128xi32>
    %c2147483647_i32 = arith.constant 2147483647 : i32
    %8 = vector.broadcast %c2147483647_i32 : i32 to vector<16x128xi32>
    %9 = arith.andi %7, %8 : vector<16x128xi32>
    %10 = arith.xori %5, %9 : vector<16x128xi32>
    %11 = tpu.bitcast %10 : vector<16x128xi32> -> vector<16x128xf32>
    %c0_2 = arith.constant 0 : index
    %c0_3 = arith.constant 0 : index
    %12 = vector.load %arg3[%c0_2, %c0_3] : memref<16x128xf32, #tpu.memory_space<vmem>>, vector<16x128xf32>
    tpu.vector_store %arg3[%c0_2, %c0_3], %11 {strides = array<i32>} : memref<16x128xf32, #tpu.memory_space<vmem>>, vector<16x128xf32>,
    %c-2147483648_i32 = arith.constant -2147483648 : i32
    %13 = vector.broadcast %c-2147483648_i32 : i32 to vector<1x1xi32>
    %c2147483647_i32_4 = arith.constant 2147483647 : i32
    %14 = vector.broadcast %c2147483647_i32_4 : i32 to vector<1x1xi32>
    %c0_i32 = arith.constant 0 : i32
    %c16_i32 = arith.constant 16 : i32
    %15 = arith.addi %c0_i32, %c16_i32 : i32
    %c1_i32 = arith.constant 1 : i32
    %16:4 = scf.for %arg5 = %c0_i32 to %15 step %c1_i32 iter_args(%arg6 = %13, %arg7 = %14, %arg8 = %13, %arg9 = %14) -> (vector<1x1xi32>, vector<1x1xi32>, vector<1x1xi32>, vector<1x1xi32>)  : i32 {
      %c1_i32_20 = arith.constant 1 : i32
      %63 = vector.broadcast %c1_i32_20 : i32 to vector<1x1xi32>
      %64 = arith.shrsi %arg6, %63 : vector<1x1xi32>
      %c1_i32_21 = arith.constant 1 : i32
      %65 = vector.broadcast %c1_i32_21 : i32 to vector<1x1xi32>
      %66 = arith.shrsi %arg7, %65 : vector<1x1xi32>
      %67 = arith.addi %64, %66 : vector<1x1xi32>
      %68 = arith.andi %arg6, %arg7 : vector<1x1xi32>
      %c1_i32_22 = arith.constant 1 : i32
      %69 = vector.broadcast %c1_i32_22 : i32 to vector<1x1xi32>
      %70 = arith.andi %68, %69 : vector<1x1xi32>
      %71 = arith.addi %67, %70 : vector<1x1xi32>
      %c1_i32_23 = arith.constant 1 : i32
      %72 = vector.broadcast %c1_i32_23 : i32 to vector<1x1xi32>
      %73 = arith.shrsi %arg8, %72 : vector<1x1xi32>
      %c1_i32_24 = arith.constant 1 : i32
      %74 = vector.broadcast %c1_i32_24 : i32 to vector<1x1xi32>
      %75 = arith.shrsi %arg9, %74 : vector<1x1xi32>
      %76 = arith.addi %73, %75 : vector<1x1xi32>
      %77 = arith.andi %arg8, %arg9 : vector<1x1xi32>
      %c1_i32_25 = arith.constant 1 : i32
      %78 = vector.broadcast %c1_i32_25 : i32 to vector<1x1xi32>
      %79 = arith.andi %77, %78 : vector<1x1xi32>
      %80 = arith.addi %76, %79 : vector<1x1xi32>
      %c0_26 = arith.constant 0 : index
      %c0_27 = arith.constant 0 : index
      %81 = vector.load %arg3[%c0_26, %c0_27] : memref<16x128xf32, #tpu.memory_space<vmem>>, vector<16x128xf32>
      %82 = tpu.bitcast %81 : vector<16x128xf32> -> vector<16x128xi32>
      %83 = vector.broadcast %71 : vector<1x1xi32> to vector<16x128xi32>
      %84 = arith.cmpi sle, %82, %83 : vector<16x128xi32>
      %85 = arith.extui %84 : vector<16x128xi1> to vector<16x128xi32>
      %86 = vector.shape_cast %85 : vector<16x128xi32> to vector<1x16x128xi32>
      %cst_28 = arith.constant dense<0> : vector<1xi32>
      %87 = vector.multi_reduction <add>, %86, %cst_28 [1, 2] : vector<1x16x128xi32> to vector<1xi32>
      %88 = vector.shape_cast %87 : vector<1xi32> to vector<1x1x1xi32>
      %89 = vector.extract %88[0, 0, 0] : i32 from vector<1x1x1xi32>
      %90 = vector.broadcast %89 : i32 to vector<1x1xi32>
      %91 = vector.broadcast %80 : vector<1x1xi32> to vector<16x128xi32>
      %92 = arith.cmpi sle, %82, %91 : vector<16x128xi32>
      %93 = arith.extui %92 : vector<16x128xi1> to vector<16x128xi32>
      %94 = vector.shape_cast %93 : vector<16x128xi32> to vector<1x16x128xi32>
      %cst_29 = arith.constant dense<0> : vector<1xi32>
      %95 = vector.multi_reduction <add>, %94, %cst_29 [1, 2] : vector<1x16x128xi32> to vector<1xi32>
      %96 = vector.shape_cast %95 : vector<1xi32> to vector<1x1x1xi32>
      %97 = vector.extract %96[0, 0, 0] : i32 from vector<1x1x1xi32>
      %98 = vector.broadcast %97 : i32 to vector<1x1xi32>
      %c103_i32 = arith.constant 103 : i32
      %99 = vector.broadcast %c103_i32 : i32 to vector<1x1xi32>
      %100 = arith.cmpi sge, %90, %99 : vector<1x1xi32>
      %c1946_i32 = arith.constant 1946 : i32
      %101 = vector.broadcast %c1946_i32 : i32 to vector<1x1xi32>
      %102 = arith.cmpi sge, %98, %101 : vector<1x1xi32>
      %c1_i32_30 = arith.constant 1 : i32
      %103 = vector.broadcast %c1_i32_30 : i32 to vector<1x1xi32>
      %104 = arith.addi %71, %103 : vector<1x1xi32>
      %105 = arith.select %100, %arg6, %104 : vector<1x1xi1>, vector<1x1xi32>
      %106 = arith.select %100, %71, %arg7 : vector<1x1xi1>, vector<1x1xi32>
      %c1_i32_31 = arith.constant 1 : i32
      %107 = vector.broadcast %c1_i32_31 : i32 to vector<1x1xi32>
      %108 = arith.addi %80, %107 : vector<1x1xi32>
      %109 = arith.select %102, %arg8, %108 : vector<1x1xi1>, vector<1x1xi32>
      %110 = arith.select %102, %80, %arg9 : vector<1x1xi1>, vector<1x1xi32>
      %c1_i32_32 = arith.constant 1 : i32
      %111 = vector.broadcast %c1_i32_32 : i32 to vector<1x1xi32>
      %112 = arith.shrsi %105, %111 : vector<1x1xi32>
      %c1_i32_33 = arith.constant 1 : i32
      %113 = vector.broadcast %c1_i32_33 : i32 to vector<1x1xi32>
      %114 = arith.shrsi %106, %113 : vector<1x1xi32>
      %115 = arith.addi %112, %114 : vector<1x1xi32>
      %116 = arith.andi %105, %106 : vector<1x1xi32>
      %c1_i32_34 = arith.constant 1 : i32
      %117 = vector.broadcast %c1_i32_34 : i32 to vector<1x1xi32>
      %118 = arith.andi %116, %117 : vector<1x1xi32>
      %119 = arith.addi %115, %118 : vector<1x1xi32>
      %c1_i32_35 = arith.constant 1 : i32
      %120 = vector.broadcast %c1_i32_35 : i32 to vector<1x1xi32>
      %121 = arith.shrsi %109, %120 : vector<1x1xi32>
      %c1_i32_36 = arith.constant 1 : i32
      %122 = vector.broadcast %c1_i32_36 : i32 to vector<1x1xi32>
      %123 = arith.shrsi %110, %122 : vector<1x1xi32>
      %124 = arith.addi %121, %123 : vector<1x1xi32>
      %125 = arith.andi %109, %110 : vector<1x1xi32>
      %c1_i32_37 = arith.constant 1 : i32
      %126 = vector.broadcast %c1_i32_37 : i32 to vector<1x1xi32>
      %127 = arith.andi %125, %126 : vector<1x1xi32>
      %128 = arith.addi %124, %127 : vector<1x1xi32>
      %c0_38 = arith.constant 0 : index
      %c0_39 = arith.constant 0 : index
      %129 = vector.load %arg3[%c0_38, %c0_39] : memref<16x128xf32, #tpu.memory_space<vmem>>, vector<16x128xf32>
      %130 = tpu.bitcast %129 : vector<16x128xf32> -> vector<16x128xi32>
      %131 = vector.broadcast %119 : vector<1x1xi32> to vector<16x128xi32>
      %132 = arith.cmpi sle, %130, %131 : vector<16x128xi32>
      %133 = arith.extui %132 : vector<16x128xi1> to vector<16x128xi32>
      %134 = vector.shape_cast %133 : vector<16x128xi32> to vector<1x16x128xi32>
      %cst_40 = arith.constant dense<0> : vector<1xi32>
      %135 = vector.multi_reduction <add>, %134, %cst_40 [1, 2] : vector<1x16x128xi32> to vector<1xi32>
      %136 = vector.shape_cast %135 : vector<1xi32> to vector<1x1x1xi32>
      %137 = vector.extract %136[0, 0, 0] : i32 from vector<1x1x1xi32>
      %138 = vector.broadcast %137 : i32 to vector<1x1xi32>
      %139 = vector.broadcast %128 : vector<1x1xi32> to vector<16x128xi32>
      %140 = arith.cmpi sle, %130, %139 : vector<16x128xi32>
      %141 = arith.extui %140 : vector<16x128xi1> to vector<16x128xi32>
      %142 = vector.shape_cast %141 : vector<16x128xi32> to vector<1x16x128xi32>
      %cst_41 = arith.constant dense<0> : vector<1xi32>
      %143 = vector.multi_reduction <add>, %142, %cst_41 [1, 2] : vector<1x16x128xi32> to vector<1xi32>
      %144 = vector.shape_cast %143 : vector<1xi32> to vector<1x1x1xi32>
      %145 = vector.extract %144[0, 0, 0] : i32 from vector<1x1x1xi32>
      %146 = vector.broadcast %145 : i32 to vector<1x1xi32>
      %c103_i32_42 = arith.constant 103 : i32
      %147 = vector.broadcast %c103_i32_42 : i32 to vector<1x1xi32>
      %148 = arith.cmpi sge, %138, %147 : vector<1x1xi32>
      %c1946_i32_43 = arith.constant 1946 : i32
      %149 = vector.broadcast %c1946_i32_43 : i32 to vector<1x1xi32>
      %150 = arith.cmpi sge, %146, %149 : vector<1x1xi32>
      %c1_i32_44 = arith.constant 1 : i32
      %151 = vector.broadcast %c1_i32_44 : i32 to vector<1x1xi32>
      %152 = arith.addi %119, %151 : vector<1x1xi32>
      %153 = arith.select %148, %105, %152 : vector<1x1xi1>, vector<1x1xi32>
      %154 = arith.select %148, %119, %106 : vector<1x1xi1>, vector<1x1xi32>
      %c1_i32_45 = arith.constant 1 : i32
      %155 = vector.broadcast %c1_i32_45 : i32 to vector<1x1xi32>
      %156 = arith.addi %128, %155 : vector<1x1xi32>
      %157 = arith.select %150, %109, %156 : vector<1x1xi1>, vector<1x1xi32>
      %158 = arith.select %150, %128, %110 : vector<1x1xi1>, vector<1x1xi32>
      scf.yield %153, %154, %157, %158 : vector<1x1xi32>, vector<1x1xi32>, vector<1x1xi32>, vector<1x1xi32>
    }
    %c31_i32_5 = arith.constant 31 : i32
    %17 = vector.broadcast %c31_i32_5 : i32 to vector<1x1xi32>
    %18 = arith.shrsi %16#0, %17 : vector<1x1xi32>
    %c2147483647_i32_6 = arith.constant 2147483647 : i32
    %19 = vector.broadcast %c2147483647_i32_6 : i32 to vector<1x1xi32>
    %20 = arith.andi %18, %19 : vector<1x1xi32>
    %21 = arith.xori %16#0, %20 : vector<1x1xi32>
    %22 = tpu.bitcast %21 : vector<1x1xi32> -> vector<1x1xf32>
    %c31_i32_7 = arith.constant 31 : i32
    %23 = vector.broadcast %c31_i32_7 : i32 to vector<1x1xi32>
    %24 = arith.shrsi %16#2, %23 : vector<1x1xi32>
    %c2147483647_i32_8 = arith.constant 2147483647 : i32
    %25 = vector.broadcast %c2147483647_i32_8 : i32 to vector<1x1xi32>
    %26 = arith.andi %24, %25 : vector<1x1xi32>
    %27 = arith.xori %16#2, %26 : vector<1x1xi32>
    %28 = tpu.bitcast %27 : vector<1x1xi32> -> vector<1x1xf32>
    %29 = arith.mulf %0, %1 : f32
    %cst = arith.constant 1.000000e+00 : f32
    %30 = arith.subf %cst, %0 : f32
    %31 = vector.broadcast %30 : f32 to vector<1x1xf32>
    %32 = arith.mulf %31, %22 : vector<1x1xf32>
    %33 = vector.broadcast %29 : f32 to vector<1x1xf32>
    %34 = arith.addf %33, %32 : vector<1x1xf32>
    %35 = arith.mulf %0, %2 : f32
    %cst_9 = arith.constant 1.000000e+00 : f32
    %36 = arith.subf %cst_9, %0 : f32
    %37 = vector.broadcast %36 : f32 to vector<1x1xf32>
    %38 = arith.mulf %37, %28 : vector<1x1xf32>
    %39 = vector.broadcast %35 : f32 to vector<1x1xf32>
    %40 = arith.addf %39, %38 : vector<1x1xf32>
    %41 = arith.subf %40, %34 : vector<1x1xf32>
    %42 = vector.broadcast %3 : f32 to vector<1x1xf32>
    %43 = arith.maximumf %41, %42 : vector<1x1xf32>
    %cst_10 = arith.constant 1.000000e+00 : f32
    %44 = vector.broadcast %cst_10 : f32 to vector<1x1xf32>
    %45 = arith.divf %44, %43 : vector<1x1xf32>
    %c0_11 = arith.constant 0 : index
    %c0_12 = arith.constant 0 : index
    %46 = vector.load %arg2[%c0_11, %c0_12] : memref<16x128xf32, #tpu.memory_space<vmem>>, vector<16x128xf32>
    %47 = vector.broadcast %45 : vector<1x1xf32> to vector<16x128xf32>
    %48 = arith.mulf %46, %47 : vector<16x128xf32>
    %c0_13 = arith.constant 0 : index
    %c0_14 = arith.constant 0 : index
    %49 = vector.load %arg3[%c0_13, %c0_14] : memref<16x128xf32, #tpu.memory_space<vmem>>, vector<16x128xf32>
    tpu.vector_store %arg3[%c0_13, %c0_14], %48 {strides = array<i32>} : memref<16x128xf32, #tpu.memory_space<vmem>>, vector<16x128xf32>,
    %50 = tpu.iota {dimensions = array<i32: 1>} : vector<1x128xi32>
    %c0_i32_15 = arith.constant 0 : i32
    %51 = vector.broadcast %c0_i32_15 : i32 to vector<1x128xi32>
    %52 = arith.cmpi eq, %50, %51 : vector<1x128xi32>
    %c1_i32_16 = arith.constant 1 : i32
    %53 = vector.broadcast %c1_i32_16 : i32 to vector<1x128xi32>
    %54 = arith.cmpi eq, %50, %53 : vector<1x128xi32>
    %cst_17 = arith.constant 0.000000e+00 : f32
    %55 = vector.shape_cast %40 : vector<1x1xf32> to vector<1x1xf32>
    %56 = vector.broadcast %55 : vector<1x1xf32> to vector<1x128xf32>
    %57 = vector.broadcast %cst_17 : f32 to vector<1x128xf32>
    %58 = arith.select %54, %56, %57 : vector<1x128xi1>, vector<1x128xf32>
    %59 = vector.shape_cast %34 : vector<1x1xf32> to vector<1x1xf32>
    %60 = vector.broadcast %59 : vector<1x1xf32> to vector<1x128xf32>
    %61 = arith.select %52, %60, %58 : vector<1x128xi1>, vector<1x128xf32>
    %c0_18 = arith.constant 0 : index
    %c0_19 = arith.constant 0 : index
    %62 = vector.load %arg4[%c0_18, %c0_19] : memref<1x128xf32, #tpu.memory_space<vmem>>, vector<1x128xf32>
    tpu.vector_store %arg4[%c0_18, %c0_19], %61 {strides = array<i32>} : memref<1x128xf32, #tpu.memory_space<vmem>>, vector<1x128xf32>,
    return
  }
  func.func @transform_0(%arg0: i32) -> i32 {
    %c0_i32 = arith.constant 0 : i32
    %c0_i32_0 = arith.constant 0 : i32
    return %c0_i32 : i32
  }
  func.func @transform_1(%arg0: i32) -> (i32, i32) {
    %c0_i32 = arith.constant 0 : i32
    %c0_i32_0 = arith.constant 0 : i32
    %c0_i32_1 = arith.constant 0 : i32
    return %c0_i32, %c0_i32_0 : i32, i32
  }
  func.func @transform_2(%arg0: i32) -> (i32, i32) {
    %c0_i32 = arith.constant 0 : i32
    %c0_i32_0 = arith.constant 0 : i32
    %c0_i32_1 = arith.constant 0 : i32
    return %c0_i32, %c0_i32_0 : i32, i32
  }
  func.func @transform_3(%arg0: i32) -> (i32, i32) {
    %c0_i32 = arith.constant 0 : i32
    %c0_i32_0 = arith.constant 0 : i32
    %c0_i32_1 = arith.constant 0 : i32
    return %c0_i32, %c0_i32_0 : i32, i32
  }
}

</mosaic_0001>

<bundles_post_ra>
// kernel: ema_quantile_normalize.1
= control target key start
LH: loop header
LB: loop body
LE: loop exit
PB: predicated region body
PF: predicated region fallthrough
CT: control target
= control target key end

     0   :  { %9 = vsyncpa [#allocation3], 0  ;;  %s541_s0 = inlined_call_operand.vmem [shape: f32[4], index: 0, kind: input, shape index: {}]   ;;  %s542_s1 = inlined_call_operand.vmem [shape: f32[16,128], index: 1, kind: input, shape index: {}]   ;;  %s543_s2 = inlined_call_operand.vmem [shape: f32[16,128], index: 2, kind: output, shape index: {0}]   ;;  %s544_s3 = inlined_call_operand.vmem [shape: f32[1,128], index: 3, kind: output, shape index: {1}]  }
   0x1   :  { %s16_s14 = sshll.u32 %s541_s0, 4  ;;  %s17_s14 = int_to_ptr.vmem [resolvable:$true] %s16_s14 }
   0x2   :  { %s315_s15 = scalar_lea.vmem %s17_s14, 16  ;;  %p320_p1 = scmp.lt.s32.totalorder %s17_s14, %s17_s14 }
   0x3   :  { %p316_p0 = scmp.ne.s32.totalorder %s17_s14, %s315_s15  ;;  %p321_p2 = scmp.lt.s32.totalorder %s315_s15, %s315_s15 }
   0x5   :  { %p322_p3 = por %p321_p2, %p320_p1 }
   0x7   :  { %p323_p4 = pnand %p322_p3, %p316_p0 }
   0x9   :  { %326 = shalt.err (!%p323_p4)
}
   0xa   :  { %s369_s16 = smov [#allocation2]  }
   0xb   :  { %19 = dma.vmem_to_smem %s17_s14, 16, %s369_s16, [#allocation3]  }
   0xc   :  { %347 = dma.done.wait [#allocation3], 16  }
   0xd   :  { %348 = vsyncadd [#allocation3], 4294967280 }
   0xe   :  { %25 = sfence }
   0xf   :  { %s394_s17 = sld [smem:[#allocation2]]  ;;  %s396_s18 = sld [smem:[#allocation2 + $0x1]]  ;;  %v30_v0 = vld [vmem:[%s542_s1] sm:$0xff]  ;;  %v31_v1 = vld [vmem:[%s542_s1 + $0x8] sm:$0xff]  ;;  %v414_v8 = vmov 2147483647  }
  0x10   :  { %s404_s22 = sld [smem:[#allocation2 + $0x2]]  ;;  %s406_s23 = sld [smem:[#allocation2 + $0x3]]  ;;  %v34_v2 = vshra.s32 %v30_v0, 31  ;;  %v35_v3 = vshra.s32 %v31_v1, 31  ;;  %v416_v9 = vmov 2147483648   ;;  %v420_v11 = vmov 2147483648  }
  0x11   :  { %v418_v10 = vmov 2147483647   ;;  %s422_s28 = smov 0  }
  0x12   :  { %v36_v4 = vand.u32 2147483647, %v34_v2  ;;  %v37_v5 = vand.u32 2147483647, %v35_v3 }
  0x14   :  { %v38_v6 = vxor.u32 %v36_v4, %v30_v0  ;;  %v39_v7 = vxor.u32 %v37_v5, %v31_v1 }
  0x16   :  { %42 = vst [vmem:[%s543_s2] sm:$0xff] %v38_v6  ;;  %43 = vst [vmem:[%s543_s2 + $0x8] sm:$0xff] %v39_v7 }
  0x17 LB: > { %v54_v12 = vshra.s32 %v363_v11, 1  ;;  %v55_v13 = vshra.s32 %v359_v10, 1  ;;  %v57_v14 = vand.u32 %v359_v10, %v363_v11  ;;  %v60_v15 = vshra.s32 %v355_v9, 1  ;;  %s49_s28 = sadd.s32 1, %s367_s28   ;;  %s367_s28 = sphi %s422_s28, %s49_s28   ;;  %v363_v11 = vphi %v420_v11, %v547_v11   ;;  %v359_v10 = vphi %v418_v10, %v546_v10   ;;  %v355_v9 = vphi %v416_v9, %v545_v9   ;;  %v351_v8 = vphi %v414_v8, %v197_v8  }
  0x18   : > { %v61_v16 = vshra.s32 %v351_v8, 1  ;;  %v63_v17 = vand.u32 %v351_v8, %v355_v9  ;;  %v370_v26 = vmov 0   ;;  %p46_p5 = scmp.ge.s32.totalorder %s49_s28, 16  }
  0x19   : > { %v56_v18 = vadd.s32 %v55_v13, %v54_v12  ;;  %v58_v19 = vand.u32 1, %v57_v14  ;;  %s206_s10 = smul.f32 (%p46_p5), %s396_s18, %s394_s17  ;;  %s207_s11 = ssub.f32 (%p46_p5), 1.0, %s394_s17 }
  0x1a   : > { %v62_v22 = vadd.s32 %v61_v16, %v60_v15  ;;  %v64_v23 = vand.u32 1, %v63_v17  ;;  %s212_s12 = smul.f32 (%p46_p5), %s404_s22, %s394_s17 }
  0x1b   : > { %v59_v24 = vadd.s32 %v58_v19, %v56_v18 }
  0x1c   : > { %v457_v25 = vadd.s32 %v64_v23, %v62_v22 }
  0x1d   : > { %v450_v20 = vld [vmem:[%s543_s2] sm:$0xff]  ;;  %v455_v21 = vld [vmem:[%s543_s2 + $0x8] sm:$0xff]  ;;  %v122_v1 = vadd.s32 1, %v59_v24 }
  0x1e   : > { %vm70_vm0 = vcmp.le.s32.totalorder %v450_v20, %v59_v24  ;;  %vm71_vm1 = vcmp.le.s32.totalorder %v455_v21, %v59_v24  ;;  %vm95_vm2 = vcmp.le.s32.totalorder %v450_v20, %v457_v25  ;;  %vm96_vm3 = vcmp.le.s32.totalorder %v455_v21, %v457_v25 }
  0x1f   : > { %v72_v27 = vsel %vm70_vm0, 1, %v370_v26  ;;  %v73_v28 = vsel %vm71_vm1, 1, %v370_v26  ;;  %v97_v30 = vsel %vm95_vm2, 1, %v370_v26  ;;  %v98_v31 = vsel %vm96_vm3, 1, %v370_v26 }
  0x20   : > { %v74_v29 = vadd.s32 %v73_v28, %v72_v27  ;;  %v99_v32 = vadd.s32 %v98_v31, %v97_v30  ;;  %v125_v5 = vadd.s32 1, %v457_v25 }
  0x22   : > { %v76_v33 = vshrl.u32 %v74_v29, 16  ;;  %v75_v34 = vand.u32 65535, %v74_v29  ;;  %v101_v35 = vshrl.u32 %v99_v32, 16  ;;  %v100_v36 = vand.u32 65535, %v99_v32 }
  0x24   : > { %v78_v37 = vcvt.s32.f32 %v76_v33  ;;  %v77_v38 = vcvt.s32.f32 %v75_v34  ;;  %v103_v39 = vcvt.s32.f32 %v101_v35  ;;  %v102_v40 = vcvt.s32.f32 %v100_v36 }
  0x26   : > { %81 = vadd.xlane.f32.xlu0 %v78_v37  ;;  %79 = vadd.xlane.f32.xlu1 %v77_v38 }
  0x2a   : > { %106 = vadd.xlane.f32.xlu0 %v103_v39  ;;  %104 = vadd.xlane.f32.xlu1 %v102_v40 }
  0xb3   : > { %v82_v41 = vpop.xlane.xlu0 %81  ;;  %v80_v42 = vpop.xlane.xlu1 %79 }
  0xb4   : > { %v84_v43 = vcvt.f32.s32 %v82_v41  ;;  %v83_v44 = vcvt.f32.s32 %v80_v42 }
  0xb6   : > { %v85_v45 = vshll.u32 %v84_v43, 16 }
  0xb7   : > { %v107_v46 = vpop.xlane.xlu0 %106  ;;  %v105_v47 = vpop.xlane.xlu1 %104 }
  0xb8   : > { %v86_v48 = vadd.s32 %v85_v45, %v83_v44  ;;  %v109_v49 = vcvt.f32.s32 %v107_v46  ;;  %v108_v50 = vcvt.f32.s32 %v105_v47 }
  0xba   : > { %v87_v51 = vrot.slane %v86_v48, 4  ;;  %v110_v52 = vshll.u32 %v109_v49, 16 }
  0xbc   : > { %v111_v53 = vadd.s32 %v110_v52, %v108_v50  ;;  %v88_v54 = vadd.s32 %v87_v51, %v86_v48 }
  0xbe   : > { %v112_v55 = vrot.slane %v111_v53, 4  ;;  %v89_v56 = vrot.slane %v88_v54, 2 }
  0xc0   : > { %v113_v57 = vadd.s32 %v112_v55, %v111_v53  ;;  %v90_v58 = vadd.s32 %v89_v56, %v88_v54 }
  0xc2   : > { %v91_v59 = vrot.slane %v90_v58, 1  ;;  %v114_v60 = vrot.slane %v113_v57, 2 }
  0xc4   : > { %v92_v61 = vadd.s32 %v91_v59, %v90_v58  ;;  %v115_v62 = vadd.s32 %v114_v60, %v113_v57 }
  0xc6   : > { %263 = vpush %v92_v61  ;;  %v116_v63 = vrot.slane %v115_v62, 1 }
  0xc8   : > { %v117_v0 = vadd.s32 %v116_v63, %v115_v62 }
  0xca   : > { %265 = vpush %v117_v0 }
  0xf7   : > { %s264_s6 = spop %263 }
  0xf8   : > { %v94_v2 = vstv %s264_s6 }
  0xf9   : > { %vm120_vm4 = vcmp.ge.s32.totalorder %v94_v2, 103 }
  0xfa   : > { %v470_v3 = vsel %vm120_vm4, %v363_v11, %v122_v1  ;;  %v473_v4 = vsel %vm120_vm4, %v59_v24, %v359_v10 }
  0xfb   : > { %v128_v6 = vshra.s32 %v470_v3, 1  ;;  %v129_v7 = vshra.s32 %v473_v4, 1  ;;  %v131_v12 = vand.u32 %v473_v4, %v470_v3  ;;  %s266_s7 = spop %265 }
  0xfc   : > { %v119_v13 = vstv %s266_s7 }
  0xfd   : > { %v130_v14 = vadd.s32 %v129_v7, %v128_v6  ;;  %v132_v15 = vand.u32 1, %v131_v12  ;;  %vm121_vm5 = vcmp.ge.s32.totalorder %v119_v13, 1946  ;;  %v208_v7 = vstv (%p46_p5), %s207_s11 }
  0xfe   : > { %v481_v11 = vsel %vm121_vm5, %v355_v9, %v125_v5  ;;  %v485_v10 = vsel %vm121_vm5, %v457_v25, %v351_v8 }
  0xff   : > { %v487_v16 = vadd.s32 %v132_v15, %v130_v14  ;;  %v134_v17 = vshra.s32 %v481_v11, 1  ;;  %v135_v18 = vshra.s32 %v485_v10, 1  ;;  %v137_v19 = vand.u32 %v485_v10, %v481_v11 }
 0x100   :  { %v210_v15 = vstv (%p46_p5), %s206_s10 }
 0x101   : > { %v136_v22 = vadd.s32 %v135_v18, %v134_v17  ;;  %v138_v23 = vand.u32 1, %v137_v19  ;;  %vm140_vm6 = vcmp.le.s32.totalorder %v450_v20, %v487_v16  ;;  %vm141_vm7 = vcmp.le.s32.totalorder %v455_v21, %v487_v16 }
 0x102   : > { %v142_v8 = vsel %vm140_vm6, 1, %v370_v26  ;;  %v143_v9 = vsel %vm141_vm7, 1, %v370_v26  ;;  %v192_v60 = vadd.s32 1, %v487_v16  ;;  %v217_v19 = vstv (%p46_p5), %s406_s23 }
 0x103   : > { %v139_v24 = vadd.s32 %v138_v23, %v136_v22  ;;  %v144_v25 = vadd.s32 %v143_v9, %v142_v8 }
 0x105   : > { %v146_v27 = vshrl.u32 %v144_v25, 16  ;;  %vm165_vm8 = vcmp.le.s32.totalorder %v450_v20, %v139_v24  ;;  %vm166_vm9 = vcmp.le.s32.totalorder %v455_v21, %v139_v24  ;;  %v145_v31 = vand.u32 65535, %v144_v25  ;;  %v222_v25 = vld [vmem:[%s542_s1 + $0x8] sm:$0xff] (%p46_p5) }
 0x106   : > { %v167_v28 = vsel %vm165_vm8, 1, %v370_v26  ;;  %v168_v29 = vsel %vm166_vm9, 1, %v370_v26  ;;  %v195_v0 = vadd.s32 1, %v139_v24 }
 0x107   : > { %v148_v30 = vcvt.s32.f32 %v146_v27  ;;  %v169_v32 = vadd.s32 %v168_v29, %v167_v28  ;;  %v147_v34 = vcvt.s32.f32 %v145_v31 }
 0x109   : > { %151 = vadd.xlane.f32.xlu0 %v148_v30  ;;  %v171_v33 = vshrl.u32 %v169_v32, 16  ;;  %v170_v36 = vand.u32 65535, %v169_v32 }
 0x10b   : > { %v173_v35 = vcvt.s32.f32 %v171_v33  ;;  %v172_v37 = vcvt.s32.f32 %v170_v36 }
 0x10d   : > { %149 = vadd.xlane.f32.xlu0 %v147_v34  ;;  %176 = vadd.xlane.f32.xlu1 %v173_v35 }
 0x111   : > { %174 = vadd.xlane.f32.xlu1 %v172_v37 }
 0x196   : > { %v152_v38 = vpop.xlane.xlu0 %151 }
 0x197   : > { %v154_v20 = vcvt.f32.s32 %v152_v38 }
 0x199   : > { %v155_v40 = vshll.u32 %v154_v20, 16 }
 0x19a   : > { %v150_v39 = vpop.xlane.xlu0 %149  ;;  %v177_v21 = vpop.xlane.xlu1 %176 }
 0x19b   : > { %v153_v41 = vcvt.f32.s32 %v150_v39  ;;  %v179_v42 = vcvt.f32.s32 %v177_v21 }
 0x19d   : > { %v156_v26 = vadd.s32 %v155_v40, %v153_v41  ;;  %v180_v45 = vshll.u32 %v179_v42, 16 }
 0x19e   : > { %v175_v43 = vpop.xlane.xlu1 %174 }
 0x19f   : > { %v157_v44 = vrot.slane %v156_v26, 4  ;;  %v178_v46 = vcvt.f32.s32 %v175_v43 }
 0x1a1   : > { %v158_v47 = vadd.s32 %v157_v44, %v156_v26  ;;  %v181_v48 = vadd.s32 %v180_v45, %v178_v46 }
 0x1a3   : > { %v182_v49 = vrot.slane %v181_v48, 4  ;;  %v159_v50 = vrot.slane %v158_v47, 2 }
 0x1a5   : > { %v183_v51 = vadd.s32 %v182_v49, %v181_v48  ;;  %v160_v52 = vadd.s32 %v159_v50, %v158_v47 }
 0x1a7   : > { %v161_v53 = vrot.slane %v160_v52, 1  ;;  %v184_v54 = vrot.slane %v183_v51, 2 }
 0x1a9   : > { %v162_v55 = vadd.s32 %v161_v53, %v160_v52  ;;  %v185_v56 = vadd.s32 %v184_v54, %v183_v51 }
 0x1ab   : > { %267 = vpush %v162_v55  ;;  %v186_v57 = vrot.slane %v185_v56, 1 }
 0x1ad   : > { %v187_v58 = vadd.s32 %v186_v57, %v185_v56 }
 0x1af   : > { %269 = vpush %v187_v58 }
 0x1dc   : > { %s268_s8 = spop %267 }
 0x1dd   : > { %v164_v59 = vstv %s268_s8 }
 0x1de   : > { %vm190_vm10 = vcmp.ge.s32.totalorder %v164_v59, 103  ;;  %48 = sbr.rel (!%p46_p5) target bundleno = 23 (0x17), region = 47 }
 0x1df   : > { %v193_v61 = vsel %vm190_vm10, %v470_v3, %v192_v60   ;;  %v194_v62 = vsel %vm190_vm10, %v487_v16, %v473_v4   ;;  %v227_v4 = vlaneseq (%p46_p5) }
 0x1e0   : > { %s270_s9 = spop %269  ;;  %v198_v2 = vshra.s32 (%p46_p5), %v193_v61, 31 }
 0x1e1   : > { %v189_v63 = vstv %s270_s9  ;;  %v228_v12 = vand.u32 (%p46_p5), 127, %v227_v4 }
 0x1e2   : > { %vm191_vm11 = vcmp.ge.s32.totalorder %v189_v63, 1946  ;;  %v199_v5 = vand.u32 (%p46_p5), 2147483647, %v198_v2 }
 0x1e3   : > { %v196_v1 = vsel %vm191_vm11, %v481_v11, %v195_v0   ;;  %v197_v8 = vsel %vm191_vm11, %v139_v24, %v485_v10   ;;  %v546_v10 = vmov %v194_v62  ;;  %v547_v11 = vmov %v193_v61  ;;  %v221_v24 = vld [vmem:[%s542_s1] sm:$0xff] (%p46_p5) }
 0x1e4   : > { %v545_v9 = vmov %v196_v1  ;;  %v202_v3 = vshra.s32 (%p46_p5), %v196_v1, 31  ;;  %v200_v13 = vxor.u32 (%p46_p5), %v199_v5, %v193_v61  ;;  %v214_v11 = vstv (%p46_p5), %s212_s12 }
 0x1e5   :  { %vm230_vm12 = vcmp.eq.s32.totalorder %v228_v12, 1  ;;  %vm229_vm13 = vcmp.eq.s32.totalorder %v228_v12, 0 }
 0x1e6   :  { %v203_v6 = vand.u32 2147483647, %v202_v3  ;;  %v209_v10 = vmul.f32 %v208_v7, %v200_v13 }
 0x1e8   :  { %v204_v14 = vxor.u32 %v203_v6, %v196_v1  ;;  %v211_v17 = vadd.f32 %v210_v15, %v209_v10 }
 0x1ea   :  { %v213_v16 = vmul.f32 %v208_v7, %v204_v14 }
 0x1ec   :  { %v215_v18 = vadd.f32 %v214_v11, %v213_v16 }
 0x1ee   :  { %v216_v22 = vsub.f32 %v215_v18, %v211_v17  ;;  %v231_v23 = vsel %vm230_vm12, %v215_v18, 0.0 }
 0x1ef   :  { %v232_v8 = vsel %vm229_vm13, %v211_v17, %v231_v23 }
 0x1f0   :  { %v218_v9 = vmax.f32 %v216_v22, %v217_v19  ;;  %233 = vst [vmem:[%s544_s3] sm:$0x1] %v232_v8 }
 0x1f2   :  { %313 = vrcp.f32 %v218_v9 }
 0x1fc   :  { %v314_v27 = vpop.eup %313 }
 0x1fd   :  { %v223_v28 = vmul.f32 %v314_v27, %v221_v24  ;;  %v224_v29 = vmul.f32 %v314_v27, %v222_v25 }
 0x1ff   :  { %225 = vst [vmem:[%s543_s2] sm:$0xff] %v223_v28  ;;  %226 = vst [vmem:[%s543_s2 + $0x8] sm:$0xff] %v224_v29 }
 0x200   :  { %242 = vsyncpa [#allocation3], 1 }

</bundles_post_ra>
